<compile_context>
chip_gen: v7x
topology: tpu7x:2x2x1
jax: 0.10.0
libtpu: 0.0.40
codegen_flags: <defaults>
</compile_context>

<pallas_src>
import jax
import jax.numpy as jnp
from jax.experimental import pallas as pl
from jax.experimental.pallas import tpu as pltpu


def _round_up(x, m):
    return ((x + m - 1) // m) * m


def _vmem_footprint(tm, ep, tf, w_bytes, out_bytes):
    """Rough per-call VMEM bytes (double-buffered pipeline tiles + scratch)."""
    return (2 * tm * ep * w_bytes          # x tile (resident over j, 2 bufs)
            + 2 * ep * tf * w_bytes        # W1 hidden tile
            + 2 * tf * ep * w_bytes        # W2 hidden tile
            + 2 * tf * 4 + 2 * ep * 4      # b1 / b2 tiles (f32)
            + 2 * tm * ep * out_bytes      # output tile
            + tm * ep * 4                  # f32 accumulator scratch
            + tm * tf * 4 + tm * tf * w_bytes)  # intermediate h (f32 + bf16)


# ----------------------------------------------------------------------------
# Pallas kernel.  One (row-tile, hidden-tile) step:
#   x:  (tm, Ep) bf16   W1: (Ep, tf) bf16   b1: (1, tf) f32
#   W2: (tf, Ep) bf16   b2: (1, Ep)  f32    out: (tm, Ep) out_dtype
#   acc: (tm, Ep) f32 VMEM scratch (persists across the hidden axis).
# ----------------------------------------------------------------------------
def _ffn_kernel(x_ref, w1_ref, b1_ref, w2_ref, b2_ref, o_ref, acc_ref):
    j = pl.program_id(1)

    @pl.when(j == 0)
    def _init():
        acc_ref[...] = jnp.zeros_like(acc_ref)

    # First linear (bf16 MXU inputs, f32 accumulate) + bias + relu in f32.
    h = jnp.dot(x_ref[...], w1_ref[...], preferred_element_type=jnp.float32)
    h = jnp.maximum(h + b1_ref[...], 0.0)
    # Second linear on this hidden slice; accumulate in f32.
    acc_ref[...] += jnp.dot(h.astype(w2_ref.dtype), w2_ref[...],
                            preferred_element_type=jnp.float32)

    @pl.when(j == pl.num_programs(1) - 1)
    def _store():
        o_ref[...] = (acc_ref[...] + b2_ref[...]).astype(o_ref.dtype)


# ----------------------------------------------------------------------------
# Python-side module (mirrors torch FeedForward).
# Weights are stored pre-transposed: W1_T (E, F), W2_T (F, E), so the kernel
# does plain `x @ W`.
# ----------------------------------------------------------------------------
class FeedForwardPallas:
    def __init__(self, params, model_params, *, block_rows=256, hidden_tile=512,
                 compute_dtype=jnp.bfloat16, out_dtype=jnp.bfloat16,
                 vmem_budget_bytes=24 * 1024 * 1024):
        assert block_rows % 8 == 0, "row tile must be a multiple of 8 sublanes"
        self.E = int(model_params['embedding_dim'])
        self.F = int(model_params['ff_hidden_dim'])
        self.compute_dtype = compute_dtype
        self.out_dtype = out_dtype

        E, F = self.E, self.F
        Ep = _round_up(E, 128)
        w_bytes = jnp.dtype(compute_dtype).itemsize
        out_bytes = jnp.dtype(out_dtype).itemsize

        # --- pick hidden tile tf (lane-dense, prefer >=256 for the 256-wide
        # MXU on v6e/v7x) and row tile tm under the VMEM budget.
        tf = min(_round_up(hidden_tile, 128), _round_up(F, 128))
        tm = block_rows

        def fits(tm_, tf_):
            return _vmem_footprint(tm_, Ep, tf_, w_bytes, out_bytes) <= vmem_budget_bytes

        while not fits(tm, tf) and tf > 256:
            tf = max(256, tf - 256)
        while not fits(tm, tf) and tm > 128:
            tm = max(128, tm // 2)
        while not fits(tm, tf) and tf > 128:
            tf = max(128, tf - 128)

        self.tm, self.tf = tm, tf
        self.Ep = Ep
        self.Fp = _round_up(F, tf)   # whole number of hidden tiles

        # Explicit VMEM limit: enough headroom over the footprint, but capped
        # so it is valid on v7x (64 MiB physical per TensorCore).
        fp = _vmem_footprint(tm, Ep, tf, w_bytes, out_bytes)
        self.vmem_limit = int(min(56 * 1024 * 1024,
                                  max(32 * 1024 * 1024, int(1.5 * fp))))

        # Zero padding keeps the math exact: padded hidden columns are
        # relu(0 + 0) = 0 and padded W2 rows are 0 (no contribution); padded
        # output columns / rows are sliced off.
        pe, pf = self.Ep - E, self.Fp - F
        self.w1 = jnp.pad(jnp.asarray(params['W1_T'], jnp.float32),
                          ((0, pe), (0, pf))).astype(compute_dtype)
        self.w2 = jnp.pad(jnp.asarray(params['W2_T'], jnp.float32),
                          ((0, pf), (0, pe))).astype(compute_dtype)
        self.b1 = jnp.pad(jnp.asarray(params['b1'], jnp.float32),
                          (0, pf)).reshape(1, self.Fp)
        self.b2 = jnp.pad(jnp.asarray(params['b2'], jnp.float32),
                          (0, pe)).reshape(1, self.Ep)

    def forward(self, input1):
        E, Ep, Fp, tf = self.E, self.Ep, self.Fp, self.tf
        orig_shape = input1.shape
        x2d = input1.reshape(-1, E)
        M = x2d.shape[0]

        # Shrink the row tile for small problems (keeps padding minimal).
        tm = min(self.tm, _round_up(M, 8))
        Mp = _round_up(M, tm)

        # Avoid host-side pad/cast when already aligned / already bf16
        # (the common case in a real model is to pass bf16 activations).
        xp = x2d if x2d.dtype == self.compute_dtype else x2d.astype(self.compute_dtype)
        if (Mp != M) or (Ep != E):
            xp = jnp.pad(xp, ((0, Mp - M), (0, Ep - E)))

        grid = (Mp // tm, Fp // tf)
        n_row_tiles = grid[0]

        w_bytes = jnp.dtype(self.compute_dtype).itemsize
        out_bytes = jnp.dtype(self.out_dtype).itemsize
        cost = pl.CostEstimate(
            flops=4 * Mp * Ep * Fp,                       # two matmuls
            transcendentals=0,
            bytes_accessed=(Mp * Ep * w_bytes                       # x
                            + n_row_tiles * (2 * Ep * Fp * w_bytes  # W1+W2 re-read per row tile
                                             + Fp * 4)              # b1
                            + Ep * 4                                # b2
                            + Mp * Ep * out_bytes))                 # output

        out = pl.pallas_call(
            _ffn_kernel,
            out_shape=jax.ShapeDtypeStruct((Mp, Ep), self.out_dtype),
            grid_spec=pltpu.PrefetchScalarGridSpec(
                num_scalar_prefetch=0,
                grid=grid,
                in_specs=[
                    pl.BlockSpec((tm, Ep), lambda i, j: (i, 0)),  # x rows (resident over j)
                    pl.BlockSpec((Ep, tf), lambda i, j: (0, j)),  # W1 hidden tile
                    pl.BlockSpec((1, tf), lambda i, j: (0, j)),   # b1 hidden tile
                    pl.BlockSpec((tf, Ep), lambda i, j: (j, 0)),  # W2 hidden tile
                    pl.BlockSpec((1, Ep), lambda i, j: (0, 0)),   # b2
                ],
                out_specs=pl.BlockSpec((tm, Ep), lambda i, j: (i, 0)),
                scratch_shapes=[pltpu.VMEM((tm, Ep), jnp.float32)],
            ),
            compiler_params=pltpu.CompilerParams(
                dimension_semantics=("parallel", "arbitrary"),
                vmem_limit_bytes=self.vmem_limit),
            cost_estimate=cost,
        )(xp, self.w1, self.b1, self.w2, self.b2)

        if (Mp != M) or (Ep != E):
            out = out[:M, :E]
        return out.reshape(orig_shape)


# ----------------------------------------------------------------------------
# Pure-JAX references for verification
# ----------------------------------------------------------------------------
def ref_forward_f32(params, x):
    h = jnp.maximum(x @ params['W1_T'] + params['b1'], 0.0)
    return h @ params['W2_T'] + params['b2']


def ref_forward_matched(params, x, compute_dtype=jnp.bfloat16, out_dtype=jnp.bfloat16):
    # Same numerics as the kernel (bf16 MXU inputs, f32 accumulate, bf16 out).
    xc = x.astype(compute_dtype)
    w1 = params['W1_T'].astype(compute_dtype)
    w2 = params['W2_T'].astype(compute_dtype)
    h = jnp.dot(xc, w1, preferred_element_type=jnp.float32) + params['b1']
    h = jnp.maximum(h, 0.0)
    o = jnp.dot(h.astype(compute_dtype), w2,
                preferred_element_type=jnp.float32) + params['b2']
    return o.astype(out_dtype)


# ----------------------------------------------------------------------------
if __name__ == "__main__":
    # Small but lane-dense shapes: E, F multiples of 128; 2*128 = 256 rows.
    # block_rows=128 -> 2 row tiles so both v7x TensorCores get work.
    E, Fh = 128, 256
    B, S = 2, 128
    model_params = dict(embedding_dim=E, ff_hidden_dim=Fh)

    key = jax.random.PRNGKey(0)
    k1, k2, k3, k4, k5 = jax.random.split(key, 5)
    s1 = 1.0 / (E ** 0.5)
    s2 = 1.0 / (Fh ** 0.5)
    params = {
        'W1_T': jax.random.uniform(k1, (E, Fh), jnp.float32, -s1, s1),
        'b1':   jax.random.uniform(k2, (Fh,), jnp.float32, -s1, s1),
        'W2_T': jax.random.uniform(k3, (Fh, E), jnp.float32, -s2, s2),
        'b2':   jax.random.uniform(k4, (E,), jnp.float32, -s2, s2),
    }
    x = jax.random.normal(k5, (B, S, E), jnp.float32)

    ffn = FeedForwardPallas(params, model_params, block_rows=128)
    out = jax.block_until_ready(ffn.forward(x))

    assert out.shape == (B, S, E)
    assert out.dtype == jnp.bfloat16

    # Check against a reference with identical bf16/f32 numerics.
    expected_matched = ref_forward_matched(params, x)
    assert jnp.allclose(out.astype(jnp.float32),
                        expected_matched.astype(jnp.float32),
                        atol=2e-2, rtol=2e-2), "mismatch vs matched bf16 reference"

    # Loose sanity check against the full-f32 reference (bf16 cast noise).
    expected_f32 = ref_forward_f32(params, x)
    assert jnp.allclose(out.astype(jnp.float32), expected_f32,
                        atol=6e-2, rtol=6e-2), "mismatch vs f32 reference"

    print("KERNEL_OK")
</pallas_src>

<mosaic_0001>
module attributes {stable_mosaic.version = 11 : i64} {
  func.func @_ffn_kernel(%arg0: i32, %arg1: i32, %arg2: memref<128x128xbf16, #tpu.memory_space<vmem>>, %arg3: memref<128x256xbf16, #tpu.memory_space<vmem>>, %arg4: memref<1x256xf32, #tpu.memory_space<vmem>>, %arg5: memref<256x128xbf16, #tpu.memory_space<vmem>>, %arg6: memref<1x128xf32, #tpu.memory_space<vmem>>, %arg7: memref<128x128xbf16, #tpu.memory_space<vmem>>, %arg8: memref<128x128xf32, #tpu.memory_space<vmem>>) attributes {dimension_semantics = [#tpu.dimension_semantics<parallel>, #tpu.dimension_semantics<arbitrary>], iteration_bounds = array<i64: 2, 1>, scalar_prefetch = 0 : i64, scratch_operands = 1 : i64, tpu.core_type = #tpu.core_type<tc>, window_params = [{transform_indices = @transform_0, window_bounds = array<i64: 128, 128>}, {transform_indices = @transform_1, window_bounds = array<i64: 128, 256>}, {transform_indices = @transform_2, window_bounds = array<i64: 1, 256>}, {transform_indices = @transform_3, window_bounds = array<i64: 256, 128>}, {pipeline_mode = #tpu.pipeline_mode<synchronous>, transform_indices = @transform_4, window_bounds = array<i64: 1, 128>}, {transform_indices = @transform_5, window_bounds = array<i64: 128, 128>}]} {
    %c0_i32 = arith.constant 0 : i32
    %0 = arith.cmpi eq, %arg1, %c0_i32 : i32
    %1 = arith.extui %0 : i1 to i32
    %c0_i32_0 = arith.constant 0 : i32
    %2 = arith.cmpi ne, %1, %c0_i32_0 : i32
    scf.if %2 {
      %cst_16 = arith.constant 0.000000e+00 : f32
      %20 = vector.broadcast %cst_16 : f32 to vector<128x128xf32>
      %c0_17 = arith.constant 0 : index
      %c0_18 = arith.constant 0 : index
      %21 = vector.load %arg8[%c0_17, %c0_18] : memref<128x128xf32, #tpu.memory_space<vmem>>, vector<128x128xf32>
      tpu.vector_store %arg8[%c0_17, %c0_18], %20 {strides = array<i32>} : memref<128x128xf32, #tpu.memory_space<vmem>>, vector<128x128xf32>,
    } else {
    }
    %c0 = arith.constant 0 : index
    %c0_1 = arith.constant 0 : index
    %3 = vector.load %arg2[%c0, %c0_1] : memref<128x128xbf16, #tpu.memory_space<vmem>>, vector<128x128xbf16>
    %c0_2 = arith.constant 0 : index
    %c0_3 = arith.constant 0 : index
    %4 = vector.load %arg3[%c0_2, %c0_3] : memref<128x256xbf16, #tpu.memory_space<vmem>>, vector<128x256xbf16>
    %cst = arith.constant dense<0.000000e+00> : vector<128x256xf32>
    %5 = tpu.matmul %3, %4, %cst {dimension_numbers = #tpu.dot_dimension_numbers<[1], [0], [0], [1], [0, 0, 1, 1], [], []>} : vector<128x128xbf16>, vector<128x256xbf16>, vector<128x256xf32> -> vector<128x256xf32>
    %c0_4 = arith.constant 0 : index
    %c0_5 = arith.constant 0 : index
    %6 = vector.load %arg4[%c0_4, %c0_5] : memref<1x256xf32, #tpu.memory_space<vmem>>, vector<1x256xf32>
    %7 = vector.broadcast %6 : vector<1x256xf32> to vector<128x256xf32>
    %8 = arith.addf %5, %7 : vector<128x256xf32>
    %cst_6 = arith.constant 0.000000e+00 : f32
    %9 = vector.broadcast %cst_6 : f32 to vector<128x256xf32>
    %10 = arith.maximumf %8, %9 : vector<128x256xf32>
    %c0_7 = arith.constant 0 : index
    %c0_8 = arith.constant 0 : index
    %11 = vector.load %arg8[%c0_7, %c0_8] : memref<128x128xf32, #tpu.memory_space<vmem>>, vector<128x128xf32>
    %12 = arith.truncf %10 : vector<128x256xf32> to vector<128x256xbf16>
    %c0_9 = arith.constant 0 : index
    %c0_10 = arith.constant 0 : index
    %13 = vector.load %arg5[%c0_9, %c0_10] : memref<256x128xbf16, #tpu.memory_space<vmem>>, vector<256x128xbf16>
    %cst_11 = arith.constant dense<0.000000e+00> : vector<128x128xf32>
    %14 = tpu.matmul %12, %13, %cst_11 {dimension_numbers = #tpu.dot_dimension_numbers<[1], [0], [0], [1], [0, 0, 1, 1], [], []>} : vector<128x256xbf16>, vector<256x128xbf16>, vector<128x128xf32> -> vector<128x128xf32>
    %15 = arith.addf %11, %14 : vector<128x128xf32>
    %c0_12 = arith.constant 0 : index
    %c0_13 = arith.constant 0 : index
    %16 = vector.load %arg8[%c0_12, %c0_13] : memref<128x128xf32, #tpu.memory_space<vmem>>, vector<128x128xf32>
    tpu.vector_store %arg8[%c0_12, %c0_13], %15 {strides = array<i32>} : memref<128x128xf32, #tpu.memory_space<vmem>>, vector<128x128xf32>,
    %c0_i32_14 = arith.constant 0 : i32
    %17 = arith.cmpi eq, %arg1, %c0_i32_14 : i32
    %18 = arith.extui %17 : i1 to i32
    %c0_i32_15 = arith.constant 0 : i32
    %19 = arith.cmpi ne, %18, %c0_i32_15 : i32
    scf.if %19 {
      %c0_16 = arith.constant 0 : index
      %c0_17 = arith.constant 0 : index
      %20 = vector.load %arg8[%c0_16, %c0_17] : memref<128x128xf32, #tpu.memory_space<vmem>>, vector<128x128xf32>
      %c0_18 = arith.constant 0 : index
      %c0_19 = arith.constant 0 : index
      %21 = vector.load %arg6[%c0_18, %c0_19] : memref<1x128xf32, #tpu.memory_space<vmem>>, vector<1x128xf32>
      %22 = vector.broadcast %21 : vector<1x128xf32> to vector<128x128xf32>
      %23 = arith.addf %20, %22 : vector<128x128xf32>
      %24 = arith.truncf %23 : vector<128x128xf32> to vector<128x128xbf16>
      %c0_20 = arith.constant 0 : index
      %c0_21 = arith.constant 0 : index
      %25 = vector.load %arg7[%c0_20, %c0_21] : memref<128x128xbf16, #tpu.memory_space<vmem>>, vector<128x128xbf16>
      tpu.vector_store %arg7[%c0_20, %c0_21], %24 {strides = array<i32>} : memref<128x128xbf16, #tpu.memory_space<vmem>>, vector<128x128xbf16>,
    } else {
    }
    return
  }
  func.func @transform_0(%arg0: i32, %arg1: i32) -> (i32, i32) {
    %c0_i32 = arith.constant 0 : i32
    %c0_i32_0 = arith.constant 0 : i32
    return %arg0, %c0_i32 : i32, i32
  }
  func.func @transform_1(%arg0: i32, %arg1: i32) -> (i32, i32) {
    %c0_i32 = arith.constant 0 : i32
    %c0_i32_0 = arith.constant 0 : i32
    return %c0_i32, %arg1 : i32, i32
  }
  func.func @transform_2(%arg0: i32, %arg1: i32) -> (i32, i32) {
    %c0_i32 = arith.constant 0 : i32
    %c0_i32_0 = arith.constant 0 : i32
    return %c0_i32, %arg1 : i32, i32
  }
  func.func @transform_3(%arg0: i32, %arg1: i32) -> (i32, i32) {
    %c0_i32 = arith.constant 0 : i32
    %c0_i32_0 = arith.constant 0 : i32
    return %arg1, %c0_i32 : i32, i32
  }
  func.func @transform_4(%arg0: i32, %arg1: i32) -> (i32, i32) {
    %c0_i32 = arith.constant 0 : i32
    %c0_i32_0 = arith.constant 0 : i32
    %c0_i32_1 = arith.constant 0 : i32
    return %c0_i32, %c0_i32_0 : i32, i32
  }
  func.func @transform_5(%arg0: i32, %arg1: i32) -> (i32, i32) {
    %c0_i32 = arith.constant 0 : i32
    %c0_i32_0 = arith.constant 0 : i32
    return %arg0, %c0_i32 : i32, i32
  }
}

</mosaic_0001>

<bundles_post_ra>
// kernel: tpu_custom_call.1
= control target key start
LH: loop header
LB: loop body
LE: loop exit
PB: predicated region body
PF: predicated region fallthrough
CT: control target
= control target key end

     0   :  { %10 = vsyncpa [#allocation4], 0  ;;  %s2115_s0 = inlined_call_operand.hbm [shape: bf16[256,128], index: 0, kind: input, shape index: {}]   ;;  %s2116_s1 = inlined_call_operand.hbm [shape: bf16[128,256], index: 1, kind: input, shape index: {}]   ;;  %s2117_s2 = inlined_call_operand.vmem [shape: f32[1,256], index: 2, kind: input, shape index: {}]   ;;  %s2118_s3 = inlined_call_operand.hbm [shape: bf16[256,128], index: 3, kind: input, shape index: {}]   ;;  %s2119_s4 = inlined_call_operand.vmem [shape: f32[1,128], index: 4, kind: input, shape index: {}]   ;;  %s2120_s5 = inlined_call_operand.hbm [shape: bf16[256,128], index: 5, kind: output, shape index: {}]  }
   0x1   :  { %12 = vsyncpa [#allocation4 + $0x1], 0 }
   0x2   :  { %13 = vsyncpa [#allocation7], 0 }
   0x3   :  { %14 = vsyncpa [#allocation5], 0 }
   0x4   :  { %16 = vsyncpa [#allocation5 + $0x1], 0  ;;  %s1761_s18 = smov 0   ;;  %s1763_s19 = smov 0  }
   0x5   :  { %s1765_s20 = smov 0   ;;  %s1767_s21 = smov 0  }
   0x6   :  { %s1769_s22 = smov 0   ;;  %s1771_s23 = smov 0  }
   0x7 LB: > { %s1202_s24 = sadd.s32 4294967295, %s1718_s23   ;;  %s1203_s25 = sadd.s32 4294967294, %s1718_s23   ;;  %s1718_s23 = sphi %s1771_s23, %s22_s23   ;;  %s1714_s22 = sphi %s1769_s22, %s2144_s22   ;;  %s1710_s21 = sphi %s1767_s21, %s2143_s21   ;;  %s1706_s20 = sphi %s1765_s20, %s2142_s20   ;;  %s1702_s19 = sphi %s1763_s19, %s2141_s19   ;;  %s1698_s18 = sphi %s1761_s18, %s2140_s18  }
   0x8   : > { %p54_p0 = scmp.ne.s32.totalorder %s1702_s19, %s1698_s18  ;;  %p1795_p1 = scmp.eq.s32.totalorder %s1202_s24, 0 }
   0x9   : > { %p1799_p2 = scmp.eq.s32.totalorder %s1202_s24, 1  ;;  %p183_p3 = scmp.eq.s32.totalorder %s1203_s25, 1 }
   0xa   : > { %s2126_s26 = scalar_select %p1795_p1, 1, 0 }
   0xb   : > { %p1805_p4 = por %p1795_p1, %p54_p0  ;;  %p1204_p5 = scmp.ge.s32.totalorder %s1718_s23, 1 }
   0xc   : > { %p1810_p6 = por %p183_p3, %p54_p0  ;;  %p190_p7 = scmp.lt.s32.totalorder %s1718_s23, 3 }
   0xd   : > { %s2128_s28 = scalar_select %p1805_p4, 1, 0 }
   0xe   : > { %s2129_s29 = scalar_select %p1810_p6, 1, 0 }
   0xf   : > { %p1815_p8 = pnand %p1204_p5, %p190_p7  ;;  %s1720_s6 = smov [#allocation6]  }
  0x10   : > { %s205_s7 = sshll.u32 %s1720_s6, 4  ;;  %s1721_s9 = smov [#allocation8]   ;;  %s1819_s7 = int_to_ptr.vmem [resolvable:$true] %s205_s7 }
  0x11   : > { %p1420_p9 = pneg %p1815_p8  ;;  %s229_s10 = sshll.u32 %s1721_s9, 4  ;;  %s1830_s10 = int_to_ptr.vmem [resolvable:$true] %s229_s10 }
  0x12   : > { %s1546_s13 = scalar_lea.hbm %s2116_s1, 2048 }
  0x13   : > { %p1826_p11 = pnand %p1420_p9, %p1795_p1  ;;  %p1547_p12 = scmp.ne.s32.totalorder %s2116_s1, %s1546_s13 }
  0x14   : > { %p1553_p5 = scmp.lt.u32.totalorder %s1546_s13, %s2116_s1 }
  0x15   : > { %p1548_p13 = pneg %p1826_p11 }
  0x17   : > { %p1549_p0 = pnand %p1548_p13, %p1547_p12 }
  0x19   : > { %p1550_p3 = pneg %p1549_p0 }
  0x1b   : > { %p1555_p7 = pnand %p1553_p5, %p1550_p3 }
  0x1d   : > { %1558 = shalt.err (!%p1555_p7)
}
  0x1e   : > { %s1559_s24 = scalar_lea.vmem %s1819_s7, 2048  ;;  %p1567_p1 = scmp.lt.s32.totalorder %s1819_s7, %s1819_s7 }
  0x1f   : > { %p1560_p9 = scmp.ne.s32.totalorder %s1819_s7, %s1559_s24  ;;  %p1568_p12 = scmp.lt.s32.totalorder %s1559_s24, %s1559_s24 }
  0x21   : > { %p1562_p10 = pnand %p1560_p9, %p1548_p13  ;;  %p1569_p0 = por %p1568_p12, %p1567_p1 }
  0x23   : > { %p1563_p6 = pneg %p1562_p10 }
  0x25   : > { %p1570_p4 = pnand %p1569_p0, %p1563_p6 }
  0x27   : > { %1573 = shalt.err (!%p1570_p4)
}
  0x28   : > { %s1722_s25 = smov 128   ;;  %s1723_s6 = smov 8  }
  0x29   : > { %1423 = dma.hbm_to_vmem [thread:$0]  (!%p1826_p11), %s2116_s1, 2048, %s1819_s7, [#allocation7], %s1722_s25, %s1722_s25, %s1723_s6  }
  0x2a   : > { %s1574_s14 = scalar_lea.hbm %s2118_s3, 2048 }
  0x2b   : > { %p1575_p1 = scmp.ne.s32.totalorder %s2118_s3, %s1574_s14  ;;  %p1581_p10 = scmp.lt.u32.totalorder %s1574_s14, %s2118_s3 }
  0x2d   : > { %p1577_p4 = pnand %p1575_p1, %p1548_p13 }
  0x2f   : > { %p1578_p6 = pneg %p1577_p4 }
  0x31   : > { %p1583_p3 = pnand %p1581_p10, %p1578_p6 }
  0x33   : > { %1586 = shalt.err (!%p1583_p3)
}
  0x34   : > { %s1587_s7 = scalar_lea.vmem %s1830_s10, 2048  ;;  %p1595_p12 = scmp.lt.s32.totalorder %s1830_s10, %s1830_s10 }
  0x35   : > { %p1588_p5 = scmp.ne.s32.totalorder %s1830_s10, %s1587_s7  ;;  %p1596_p0 = scmp.lt.s32.totalorder %s1587_s7, %s1587_s7 }
  0x37   : > { %p1590_p7 = pnand %p1588_p5, %p1548_p13  ;;  %p1597_p1 = por %p1596_p0, %p1595_p12 }
  0x39   : > { %p1591_p9 = pneg %p1590_p7 }
  0x3b   : > { %p1598_p4 = pnand %p1597_p1, %p1591_p9 }
  0x3d   : > { %1601 = shalt.err (!%p1598_p4)
}
  0x3e   : > { %s2124_s25 = smov 64   ;;  %s1725_s6 = smov 4  }
  0x3f   : > { %1426 = dma.hbm_to_vmem [thread:$0]  (!%p1826_p11), %s2118_s3, 2048, %s1830_s10, [#allocation7], %s2124_s25, %s2124_s25, %s1725_s6  }
  0x40   : > { %s34_s12 = sadd.s32 1, %s1714_s22  ;;  %s41_s13 = sadd.s32 1, %s1706_s20 }
  0x41   : > { %p36_p13 = scmp.ge.s32.totalorder %s34_s12, 2  ;;  %p48_p6 = scmp.ne.s32.totalorder %s1706_s20, %s1702_s19 }
  0x42   : > { %p49_p10 = scmp.eq.s32.totalorder %s1718_s23, 0  ;;  %p1437_p3 = scmp.lt.s32.totalorder %s1718_s23, 2 }
  0x43   : > { %s2146_s12 = smov (%p36_p13, %s34_s12), 0  ;;  %p1897_p7 = por %p1799_p2, %p48_p6 }
  0x44   : > { %p50_p5 = por %p49_p10, %p48_p6  ;;  %s38_s14 = ssub.s32 %s1714_s22, %s2146_s12 }
  0x45   : > { %s2132_s8 = scalar_select %p1897_p7, 1, 0 }
  0x46   : > { %s246_s15 = sand.u32 1, %s1706_s20   ;;  %p39_p9 = scmp.eq.s32.totalorder %s38_s14, 0 }
  0x47   : > { %s1209_s10 = sshll.u32 %s246_s15, 6  ;;  %s1279_s16 = sshll.u32 %s1714_s22, 10 }
  0x48   : > { %s1906_s17 = scalar_select %p39_p9, %s1706_s20, %s41_s13  }
  0x49   : > { %s1911_s9 = scalar_lea.hbm %s2115_s0, %s1279_s16  ;;  %s250_s27 = scalar_lea.vmem [#allocation3], %s1209_s10 }
  0x4a   : > { %s257_s11 = sshll.u32 %s250_s27, 4  ;;  %p1915_p2 = pnand %p1437_p3, %p50_p5  ;;  %s1919_s11 = int_to_ptr.vmem [resolvable:$true] %s257_s11 }
  0x4b   : > { %s1921_s13 = scalar_lea.sflag [#allocation4], %s246_s15  ;;  %s1602_s14 = scalar_lea.hbm %s1911_s9, 1024 }
  0x4c   : > { %p1603_p11 = scmp.ne.s32.totalorder %s1911_s9, %s1602_s14  ;;  %p1604_p12 = pneg %p1915_p2 }
  0x4d   : > { %s1607_s24 = scalar_lea.hbm %s2115_s0, 2048  ;;  %p1608_p4 = scmp.lt.u32.totalorder %s1911_s9, %s2115_s0 }
  0x4e   : > { %p1605_p0 = pnand %p1604_p12, %p1603_p11  ;;  %p1609_p13 = scmp.lt.u32.totalorder %s1607_s24, %s1602_s14 }
  0x4f   : > { %p1611_p10 = scmp.lt.u32.totalorder %s1602_s14, %s1911_s9 }
  0x50   : > { %p1606_p1 = pneg %p1605_p0  ;;  %p1610_p6 = por %p1609_p13, %p1608_p4 }
  0x52   : > { %p1612_p3 = por %p1611_p10, %p1610_p6 }
  0x54   : > { %p1613_p5 = pnand %p1612_p3, %p1606_p1 }
  0x56   : > { %1616 = shalt.err (!%p1613_p5)
}
  0x57   : > { %s1617_s15 = scalar_lea.vmem %s1919_s11, 1024  ;;  %s1726_s10 = smov [#allocation3]  }
  0x58   : > { %p1618_p9 = scmp.ne.s32.totalorder %s1919_s11, %s1617_s15  ;;  %s1622_s16 = sshll.u32 %s1726_s10, 4  ;;  %s1623_s16 = int_to_ptr.vmem [resolvable:$false] %s1622_s16 }
  0x59   : > { %s1624_s7 = scalar_lea.vmem %s1623_s16, 2048  ;;  %p1625_p7 = scmp.lt.s32.totalorder %s1919_s11, %s1623_s16 }
  0x5a   : > { %p1620_p11 = pnand %p1618_p9, %p1604_p12  ;;  %p1626_p4 = scmp.lt.s32.totalorder %s1624_s7, %s1617_s15 }
  0x5c   : > { %p1621_p0 = pneg %p1620_p11  ;;  %p1627_p13 = por %p1626_p4, %p1625_p7 }
  0x5e   : > { %p1628_p6 = pnand %p1627_p13, %p1621_p0 }
  0x60   : > { %1631 = shalt.err (!%p1628_p6)
}
  0x61   : > { %s2134_s14 = smov 64   ;;  %269 = sbr.rel (%p1815_p8) target bundleno = 655 (0x28f), region = 40 }
  0x62   : > { %1430 = dma.hbm_to_vmem [thread:$0]  (!%p1915_p2), %s1911_s9, 1024, %s1919_s11, %s1921_s13, %s2134_s14, %s2134_s14, %s1725_s6  }
  0x63   : > { %s1955_s24 = sand.u32 (!%p1815_p8), 1, %s1702_s19   ;;  %p2135_p7 = scmp.ne.s32.totalorder (!%p1815_p8), %s2128_s28, 0 }
  0x64   : > { %s1213_s27 = sshll.u32 (!%p1815_p8), %s1955_s24, 6  ;;  %s272_s15 = scalar_lea.sflag (!%p1815_p8), [#allocation4], %s1955_s24 }
  0x65   : > { %s1961_s25 = scalar_lea.vmem (!%p1815_p8), [#allocation3], %s1213_s27 }
  0x68   : > { %1685 = dma.done.wait (%p2135_p7), %s272_s15, 1024  }
  0x69   : > { %1687 = vsyncadd (%p2135_p7), %s272_s15, 4294966272  ;;  %p2136_p2 = scmp.ne.s32.totalorder %s2126_s26, 0 }
  0x6b   : > { %1689 = dma.done.wait (%p2136_p2), [#allocation7], 4096  }
  0x6c   : > { %1691 = vsyncadd (%p2136_p2), [#allocation7], 4294963200  ;;  %v1727_v0 = vmov 0   ;;  %v1498_v1 = vld [vmem:[#allocation6 + $0x4] ss:$8 sps:$4 sm:$0xff]   ;;  %v1534_v19 = vld [vmem:[#allocation8 + $0x50] sm:$0xff]   ;;  %v378_v41 = vlaneseq }
  0x6d   : > { %548 = vmatprep.mubr.bf16.mxu0 %v1727_v0  ;;  %v1500_v2 = vld [vmem:[#allocation6] ss:$8 sps:$4 sm:$0xff]   ;;  %516 = vmatprep.subr.bf16.mxu0 %v1498_v1  ;;  %v1501_v3 = vld [vmem:[#allocation6 + $0x14] ss:$8 sps:$4 sm:$0xff]   ;;  %v1503_v4 = vld [vmem:[#allocation6 + $0x10] ss:$8 sps:$4 sm:$0xff]  }
  0x6e   : > { %517 = vmatpush1.bf16.msra.mxu0 %v1500_v2  ;;  %v1504_v5 = vld [vmem:[#allocation6 + $0x24] ss:$8 sps:$4 sm:$0xff]   ;;  %v1506_v6 = vld [vmem:[#allocation6 + $0x20] ss:$8 sps:$4 sm:$0xff]   ;;  %v1507_v7 = vld [vmem:[#allocation6 + $0x34] ss:$8 sps:$4 sm:$0xff]  }
  0x6f   : > { %518 = vmatprep.subr.bf16.mxu0 %v1501_v3  ;;  %v1509_v8 = vld [vmem:[#allocation6 + $0x30] ss:$8 sps:$4 sm:$0xff]   ;;  %v1510_v9 = vld [vmem:[#allocation6 + $0x44] ss:$8 sps:$4 sm:$0xff]   ;;  %v1512_v10 = vld [vmem:[#allocation6 + $0x40] ss:$8 sps:$4 sm:$0xff]  }
  0x70   : > { %v1513_v11 = vld [vmem:[#allocation6 + $0x54] ss:$8 sps:$4 sm:$0xff]   ;;  %v1515_v12 = vld [vmem:[#allocation6 + $0x50] ss:$8 sps:$4 sm:$0xff]   ;;  %v1516_v13 = vld [vmem:[#allocation6 + $0x64] ss:$8 sps:$4 sm:$0xff]  }
  0x71   : > { %v1530_v14 = vld [vmem:[#allocation8 + $0x40] sm:$0xff]   ;;  %v1532_v17 = vld [vmem:[#allocation8 + $0x48] sm:$0xff]   ;;  %v1519_v20 = vld [vmem:[#allocation6 + $0x74] ss:$8 sps:$4 sm:$0xff]   ;;  %v379_v42 = vshrl.u32 %v378_v41, 7  ;;  %s2035_s9 = scalar_lea.vmem [#allocation9], %s1213_s27 }
  0x72   : > { %519 = vmatpush1.bf16.msra.mxu0 %v1503_v4  ;;  %v1531_v15 = vld [vmem:[#allocation8] sm:$0xff]   ;;  %1344 = vmatprep.subr.bf16.mxu1 %v1530_v14  ;;  %v1533_v18 = vld [vmem:[#allocation8 + $0x8] sm:$0xff]   ;;  %v1521_v21 = vld [vmem:[#allocation6 + $0x70] ss:$8 sps:$4 sm:$0xff]   ;;  %s1296_s11 = sshll.u32 %s1710_s21, 10  ;;  %s1086_s13 = sshll.u32 %s2035_s9, 4  ;;  %s2065_s13 = int_to_ptr.vmem [resolvable:$true] %s1086_s13 }
  0x73   : > { %520 = vmatprep.subr.bf16.mxu0 %v1504_v5  ;;  %v1518_v16 = vld [vmem:[#allocation6 + $0x60] ss:$8 sps:$4 sm:$0xff]   ;;  %1345 = vmatpush3.bf16.msra.mxu1 %v1531_v15  ;;  %v1535_v22 = vld [vmem:[#allocation8 + $0x10] sm:$0xff]   ;;  %v1536_v23 = vld [vmem:[#allocation8 + $0x58] sm:$0xff]   ;;  %v380_v43 = vsub.s32 0, %v379_v42  ;;  %v384_v45 = vsub.s32 1, %v379_v42  ;;  %s2063_s7 = scalar_lea.hbm %s2120_s5, %s1296_s11 }
  0x74   : > { %1346 = vmatprep.subr.bf16.mxu1 %v1532_v17  ;;  %v1522_v24 = vld [vmem:[%s1961_s25] sm:$0xff]   ;;  %v1537_v25 = vld [vmem:[#allocation8 + $0x18] sm:$0xff]   ;;  %v1540_v28 = vld [vmem:[#allocation8 + $0x68] sm:$0xff]   ;;  %s1073_s14 = scalar_lea.sflag [#allocation5], %s1955_s24  ;;  %s1632_s27 = scalar_lea.vmem %s2065_s13, 1024 }
  0x75   : > { %v1538_v26 = vld [vmem:[#allocation8 + $0x60] sm:$0xff]   ;;  %v1523_v29 = vld [vmem:[%s1961_s25 + $0x8] sm:$0xff]   ;;  %v1524_v30 = vld [vmem:[%s1961_s25 + $0x10] sm:$0xff]   ;;  %p1633_p8 = scmp.ne.s32.totalorder %s2065_s13, %s1632_s27  ;;  %p2137_p12 = scmp.ne.s32.totalorder %s2132_s8, 0 }
  0x76   : > { %521 = vmatpush1.bf16.msra.mxu0 %v1506_v6  ;;  %v1539_v27 = vld [vmem:[#allocation8 + $0x20] sm:$0xff]   ;;  %v1525_v31 = vld [vmem:[%s1961_s25 + $0x18] sm:$0xff]   ;;  %v1527_v33 = vld [vmem:[%s1961_s25 + $0x28] sm:$0xff]   ;;  %s1728_s21 = smov [#allocation9]  }
  0x77   : > { %522 = vmatprep.subr.bf16.mxu0 %v1507_v7  ;;  %1347 = vmatpush3.bf16.msra.mxu1 %v1533_v18  ;;  %v1526_v32 = vld [vmem:[%s1961_s25 + $0x20] sm:$0xff]   ;;  %v1528_v34 = vld [vmem:[%s1961_s25 + $0x30] sm:$0xff]   ;;  %v1529_v35 = vld [vmem:[%s1961_s25 + $0x38] sm:$0xff]   ;;  %p1634_p1 = pnand %p1633_p8, %p2137_p12  ;;  %s1636_s15 = sshll.u32 %s1728_s21, 4  ;;  %s1637_s15 = int_to_ptr.vmem [resolvable:$false] %s1636_s15 }
  0x78   : > { %1348 = vmatprep.subr.bf16.mxu1 %v1534_v19  ;;  %v1541_v36 = vld [vmem:[#allocation8 + $0x28] sm:$0xff]   ;;  %v1542_v37 = vld [vmem:[#allocation8 + $0x70] sm:$0xff]   ;;  %v1544_v39 = vld [vmem:[#allocation8 + $0x78] sm:$0xff]   ;;  %s1638_s25 = scalar_lea.vmem %s1637_s15, 2048  ;;  %p1639_p3 = scmp.lt.s32.totalorder %s2065_s13, %s1637_s15 }
  0x79   : > { %v1543_v38 = vld [vmem:[#allocation8 + $0x30] sm:$0xff]   ;;  %v1545_v40 = vld [vmem:[#allocation8 + $0x38] sm:$0xff]   ;;  %v376_v44 = vld [vmem:[%s2117_s2] sm:$0x3]  ;;  %p1635_p10 = pneg %p1634_p1  ;;  %p1640_p5 = scmp.lt.s32.totalorder %s1638_s25, %s1632_s27 }
  0x7a   : > { %523 = vmatpush1.bf16.msra.mxu0 %v1509_v8  ;;  %v1990_v46 = vrot.slane %v376_v44, %v380_v43  ;;  %v1992_v47 = vrot.slane %v376_v44, %v384_v45 }
  0x7b   : > { %524 = vmatprep.subr.bf16.mxu0 %v1510_v9  ;;  %1349 = vmatpush3.bf16.msra.mxu1 %v1535_v22  ;;  %p1641_p9 = por %p1640_p5, %p1639_p3 }
  0x7c   : > { %1350 = vmatprep.subr.bf16.mxu1 %v1536_v23 }
  0x7d   : > { %p1642_p11 = pnand %p1641_p9, %p1635_p10 }
  0x7e   : > { %525 = vmatpush1.bf16.msra.mxu0 %v1512_v10 }
  0x7f   : > { %526 = vmatprep.subr.bf16.mxu0 %v1513_v11  ;;  %1351 = vmatpush3.bf16.msra.mxu1 %v1537_v25 }
  0x80   : > { %1352 = vmatprep.subr.bf16.mxu1 %v1538_v26 }
  0x82   : > { %527 = vmatpush1.bf16.msra.mxu0 %v1515_v12 }
  0x83   : > { %528 = vmatprep.subr.bf16.mxu0 %v1516_v13  ;;  %1353 = vmatpush3.bf16.msra.mxu1 %v1539_v27 }
  0x84   : > { %1354 = vmatprep.subr.bf16.mxu1 %v1540_v28 }
  0x86   : > { %529 = vmatpush1.bf16.msra.mxu0 %v1518_v16 }
  0x87   : > { %530 = vmatprep.subr.bf16.mxu0 %v1519_v20  ;;  %1355 = vmatpush3.bf16.msra.mxu1 %v1541_v36 }
  0x88   : > { %1356 = vmatprep.subr.bf16.mxu1 %v1542_v37 }
  0x8a   : > { %531 = vmatpush1.bf16.msra.mxu0 %v1521_v21 }
  0x8b   : > { %1357 = vmatpush3.bf16.msra.mxu1 %v1543_v38 }
  0x8c   : > { %1358 = vmatprep.subr.bf16.mxu1 %v1544_v39 }
  0x8d   : > { %549 = vmatmul.mubr.bf16.vlgmr.msra.gmra.mrb[0].mxu0 %v1522_v24 }
  0x8e   : > { %558 = vmatprep.mubr.bf16.mxu0 %v1727_v0 }
  0x8f   : > { %1359 = vmatpush3.bf16.msra.mxu1 %v1545_v40 }
  0x95   : > { %559 = vmatmul.mubr.bf16.gmra.mrb[4].mxu0 %v1523_v29 }
  0x96   : > { %568 = vmatprep.mubr.bf16.mxu0 %v1727_v0 }
  0x9d   : > { %569 = vmatmul.mubr.bf16.gmra.mrb[8].mxu0 %v1524_v30 }
  0x9e   : > { %578 = vmatprep.mubr.bf16.mxu0 %v1727_v0 }
  0xa5   : > { %579 = vmatmul.mubr.bf16.gmra.mrb[12].mxu0 %v1525_v31 }
  0xa6   : > { %588 = vmatprep.mubr.bf16.mxu0 %v1727_v0 }
  0xad   : > { %589 = vmatmul.mubr.bf16.gmra.mrb[16].mxu0 %v1526_v32 }
  0xae   : > { %598 = vmatprep.mubr.bf16.mxu0 %v1727_v0 }
  0xb5   : > { %599 = vmatmul.mubr.bf16.gmra.mrb[20].mxu0 %v1527_v33 }
  0xb6   : > { %608 = vmatprep.mubr.bf16.mxu0 %v1727_v0 }
  0xbd   : > { %609 = vmatmul.mubr.bf16.gmra.mrb[24].mxu0 %v1528_v34 }
  0xbe   : > { %618 = vmatprep.mubr.bf16.mxu0 %v1727_v0 }
  0xc5   : > { %619 = vmatmul.mubr.bf16.gmra.mrb[28].mxu0 %v1529_v35 }
 0x160   : > { %v550_v48 = vpop.f32.mrb[0].mxu0 }
 0x161   : > { %v551_v49 = vadd.f32 %v550_v48, %v1990_v46  ;;  %v552_v50 = vpop.f32.mrb[1].mxu0 }
 0x162   : > { %v553_v51 = vadd.f32 %v552_v50, %v1992_v47  ;;  %v554_v52 = vpop.f32.mrb[2].mxu0 }
 0x163   : > { %v555_v53 = vadd.f32 %v554_v52, %v1990_v46  ;;  %v556_v54 = vpop.f32.mrb[3].mxu0  ;;  %v629_v56 = vmax.f32 %v551_v49, 0.0 }
 0x164   : > { %v557_v55 = vadd.f32 %v556_v54, %v1992_v47  ;;  %v630_v58 = vmax.f32 %v553_v51, 0.0 }
 0x165   : > { %v631_v57 = vmax.f32 %v555_v53, 0.0 }
 0x166   : > { %v632_v59 = vmax.f32 %v557_v55, 0.0 }
 0x167   : > { %v677_v60 = vpack.c.bf16 %v631_v57, %v629_v56 }
 0x168   : > { %v560_v61 = vpop.f32.mrb[4].mxu0  ;;  %v678_v62 = vpack.c.bf16 %v632_v59, %v630_v58 }
 0x169   : > { %v561_v63 = vadd.f32 %v560_v61, %v1990_v46  ;;  %v562_v0 = vpop.f32.mrb[5].mxu0 }
 0x16a   : > { %v563_v1 = vadd.f32 %v562_v0, %v1992_v47  ;;  %v564_v2 = vpop.f32.mrb[6].mxu0  ;;  %853 = vmatprep.mubr.bf16.mxu1 %v678_v62 }
 0x16b   : > { %v565_v3 = vadd.f32 %v564_v2, %v1990_v46  ;;  %v566_v4 = vpop.f32.mrb[7].mxu0  ;;  %854 = vmatmul.mubr.bf16.vlgmr.msra.gmra.mrb[0].mxu1 %v677_v60  ;;  %v633_v6 = vmax.f32 %v561_v63, 0.0 }
 0x16c   : > { %v567_v5 = vadd.f32 %v566_v4, %v1992_v47  ;;  %v634_v8 = vmax.f32 %v563_v1, 0.0 }
 0x16d   : > { %v635_v7 = vmax.f32 %v565_v3, 0.0 }
 0x16e   : > { %v636_v9 = vmax.f32 %v567_v5, 0.0 }
 0x16f   : > { %v679_v10 = vpack.c.bf16 %v635_v7, %v633_v6 }
 0x170   : > { %v680_v11 = vpack.c.bf16 %v636_v9, %v634_v8  ;;  %v570_v12 = vpop.f32.mrb[8].mxu0 }
 0x171   : > { %v571_v13 = vadd.f32 %v570_v12, %v1990_v46  ;;  %v572_v14 = vpop.f32.mrb[9].mxu0 }
 0x172   : > { %v573_v15 = vadd.f32 %v572_v14, %v1992_v47  ;;  %v574_v16 = vpop.f32.mrb[10].mxu0  ;;  %861 = vmatprep.mubr.bf16.mxu1 %v680_v11 }
 0x173   : > { %v575_v17 = vadd.f32 %v574_v16, %v1990_v46  ;;  %v576_v18 = vpop.f32.mrb[11].mxu0  ;;  %862 = vmatmul.mubr.bf16.gmra.mrb[4].mxu1 %v679_v10  ;;  %v637_v20 = vmax.f32 %v571_v13, 0.0 }
 0x174   : > { %v577_v19 = vadd.f32 %v576_v18, %v1992_v47  ;;  %v638_v22 = vmax.f32 %v573_v15, 0.0 }
 0x175   : > { %v639_v21 = vmax.f32 %v575_v17, 0.0 }
 0x176   : > { %v640_v23 = vmax.f32 %v577_v19, 0.0 }
 0x177   : > { %v681_v24 = vpack.c.bf16 %v639_v21, %v637_v20 }
 0x178   : > { %v682_v25 = vpack.c.bf16 %v640_v23, %v638_v22  ;;  %v580_v26 = vpop.f32.mrb[12].mxu0 }
 0x179   : > { %v581_v27 = vadd.f32 %v580_v26, %v1990_v46  ;;  %v582_v28 = vpop.f32.mrb[13].mxu0 }
 0x17a   : > { %v583_v29 = vadd.f32 %v582_v28, %v1992_v47  ;;  %v584_v30 = vpop.f32.mrb[14].mxu0  ;;  %869 = vmatprep.mubr.bf16.mxu1 %v682_v25 }
 0x17b   : > { %v585_v31 = vadd.f32 %v584_v30, %v1990_v46  ;;  %v586_v32 = vpop.f32.mrb[15].mxu0  ;;  %870 = vmatmul.mubr.bf16.gmra.mrb[8].mxu1 %v681_v24  ;;  %v641_v34 = vmax.f32 %v581_v27, 0.0 }
 0x17c   : > { %v587_v33 = vadd.f32 %v586_v32, %v1992_v47  ;;  %v642_v36 = vmax.f32 %v583_v29, 0.0 }
 0x17d   : > { %v643_v35 = vmax.f32 %v585_v31, 0.0 }
 0x17e   : > { %v644_v37 = vmax.f32 %v587_v33, 0.0 }
 0x17f   : > { %v683_v38 = vpack.c.bf16 %v643_v35, %v641_v34 }
 0x180   : > { %v684_v39 = vpack.c.bf16 %v644_v37, %v642_v36  ;;  %v590_v40 = vpop.f32.mrb[16].mxu0 }
 0x181   : > { %v591_v41 = vadd.f32 %v590_v40, %v1990_v46  ;;  %v592_v42 = vpop.f32.mrb[17].mxu0 }
 0x182   : > { %v593_v43 = vadd.f32 %v592_v42, %v1992_v47  ;;  %v594_v44 = vpop.f32.mrb[18].mxu0  ;;  %877 = vmatprep.mubr.bf16.mxu1 %v684_v39 }
 0x183   : > { %v595_v45 = vadd.f32 %v594_v44, %v1990_v46  ;;  %v596_v48 = vpop.f32.mrb[19].mxu0  ;;  %878 = vmatmul.mubr.bf16.gmra.mrb[12].mxu1 %v683_v38  ;;  %v645_v50 = vmax.f32 %v591_v41, 0.0 }
 0x184   : > { %v597_v49 = vadd.f32 %v596_v48, %v1992_v47  ;;  %v646_v52 = vmax.f32 %v593_v43, 0.0 }
 0x185   : > { %v647_v51 = vmax.f32 %v595_v45, 0.0 }
 0x186   : > { %v648_v53 = vmax.f32 %v597_v49, 0.0 }
 0x187   : > { %v685_v54 = vpack.c.bf16 %v647_v51, %v645_v50 }
 0x188   : > { %v686_v55 = vpack.c.bf16 %v648_v53, %v646_v52  ;;  %v600_v56 = vpop.f32.mrb[20].mxu0 }
 0x189   : > { %v601_v57 = vadd.f32 %v600_v56, %v1990_v46  ;;  %v602_v58 = vpop.f32.mrb[21].mxu0 }
 0x18a   : > { %v603_v59 = vadd.f32 %v602_v58, %v1992_v47  ;;  %v604_v60 = vpop.f32.mrb[22].mxu0  ;;  %885 = vmatprep.mubr.bf16.mxu1 %v686_v55 }
 0x18b   : > { %v605_v61 = vadd.f32 %v604_v60, %v1990_v46  ;;  %v606_v62 = vpop.f32.mrb[23].mxu0  ;;  %886 = vmatmul.mubr.bf16.gmra.mrb[16].mxu1 %v685_v54  ;;  %v649_v0 = vmax.f32 %v601_v57, 0.0 }
 0x18c   : > { %v607_v63 = vadd.f32 %v606_v62, %v1992_v47  ;;  %v650_v2 = vmax.f32 %v603_v59, 0.0 }
 0x18d   : > { %v651_v1 = vmax.f32 %v605_v61, 0.0 }
 0x18e   : > { %v652_v3 = vmax.f32 %v607_v63, 0.0 }
 0x18f   : > { %v687_v4 = vpack.c.bf16 %v651_v1, %v649_v0 }
 0x190   : > { %v688_v5 = vpack.c.bf16 %v652_v3, %v650_v2  ;;  %v610_v6 = vpop.f32.mrb[24].mxu0 }
 0x191   : > { %v611_v7 = vadd.f32 %v610_v6, %v1990_v46  ;;  %v612_v8 = vpop.f32.mrb[25].mxu0 }
 0x192   : > { %v613_v9 = vadd.f32 %v612_v8, %v1992_v47  ;;  %v614_v10 = vpop.f32.mrb[26].mxu0  ;;  %893 = vmatprep.mubr.bf16.mxu1 %v688_v5 }
 0x193   : > { %v615_v11 = vadd.f32 %v614_v10, %v1990_v46  ;;  %v616_v12 = vpop.f32.mrb[27].mxu0  ;;  %894 = vmatmul.mubr.bf16.gmra.mrb[20].mxu1 %v687_v4  ;;  %v653_v14 = vmax.f32 %v611_v7, 0.0 }
 0x194   : > { %v617_v13 = vadd.f32 %v616_v12, %v1992_v47  ;;  %v654_v16 = vmax.f32 %v613_v9, 0.0 }
 0x195   : > { %v655_v15 = vmax.f32 %v615_v11, 0.0 }
 0x196   : > { %v656_v17 = vmax.f32 %v617_v13, 0.0 }
 0x197   : > { %v689_v18 = vpack.c.bf16 %v655_v15, %v653_v14 }
 0x198   : > { %v690_v19 = vpack.c.bf16 %v656_v17, %v654_v16  ;;  %v620_v20 = vpop.f32.mrb[28].mxu0 }
 0x199   : > { %v621_v21 = vadd.f32 %v620_v20, %v1990_v46  ;;  %v622_v22 = vpop.f32.mrb[29].mxu0 }
 0x19a   : > { %v623_v23 = vadd.f32 %v622_v22, %v1992_v47  ;;  %v624_v24 = vpop.f32.mrb[30].mxu0  ;;  %901 = vmatprep.mubr.bf16.mxu1 %v690_v19 }
 0x19b   : > { %v625_v25 = vadd.f32 %v624_v24, %v1990_v46  ;;  %v626_v26 = vpop.f32.mrb[31].mxu0  ;;  %902 = vmatmul.mubr.bf16.gmra.mrb[24].mxu1 %v689_v18  ;;  %v657_v28 = vmax.f32 %v621_v21, 0.0  ;;  %v2029_v46 = vld [vmem:[%s2119_s4] ss:$0 sm:$0xff] }
 0x19c   : > { %v627_v27 = vadd.f32 %v626_v26, %v1992_v47  ;;  %v658_v30 = vmax.f32 %v623_v23, 0.0 }
 0x19d   : > { %v659_v29 = vmax.f32 %v625_v25, 0.0 }
 0x19e   : > { %v660_v31 = vmax.f32 %v627_v27, 0.0 }
 0x19f   : > { %v691_v32 = vpack.c.bf16 %v659_v29, %v657_v28 }
 0x1a0   : > { %v692_v33 = vpack.c.bf16 %v660_v31, %v658_v30 }
 0x1a2   : > { %909 = vmatprep.mubr.bf16.mxu1 %v692_v33 }
 0x1a3   : > { %910 = vmatmul.mubr.bf16.gmra.mrb[28].mxu1 %v691_v32 }
 0x23e   : > { %v1360_v34 = vpop.f32.mrb[0].mxu1 }
 0x23f   : > { %v1361_v35 = vpop.f32.mrb[1].mxu1 }
 0x240   : > { %v1362_v36 = vadd.f32 %v1361_v35, %v1360_v34  ;;  %v1363_v37 = vpop.f32.mrb[2].mxu1 }
 0x241   : > { %v1364_v38 = vpop.f32.mrb[3].mxu1 }
 0x242   : > { %v1365_v47 = vadd.f32 %v1364_v38, %v1363_v37  ;;  %v976_v39 = vadd.f32 %v1362_v36, %v2029_v46 }
 0x244   : > { %v977_v40 = vadd.f32 %v1365_v47, %v2029_v46 }
 0x246   : > { %v1300_v41 = vpack.c.bf16 %v977_v40, %v976_v39  ;;  %v1366_v42 = vpop.f32.mrb[4].mxu1 }
 0x247   : > { %v1367_v43 = vpop.f32.mrb[5].mxu1 }
 0x248   : > { %1301 = vst [vmem:[%s2035_s9] sm:$0xff] %v1300_v41   ;;  %v1368_v44 = vadd.f32 %v1367_v43, %v1366_v42  ;;  %v1369_v45 = vpop.f32.mrb[6].mxu1 }
 0x249   : > { %v1370_v48 = vpop.f32.mrb[7].mxu1 }
 0x24a   : > { %v1371_v49 = vadd.f32 %v1370_v48, %v1369_v45  ;;  %v978_v50 = vadd.f32 %v1368_v44, %v2029_v46 }
 0x24c   : > { %v979_v51 = vadd.f32 %v1371_v49, %v2029_v46 }
 0x24e   : > { %v1305_v52 = vpack.c.bf16 %v979_v51, %v978_v50  ;;  %v1372_v53 = vpop.f32.mrb[8].mxu1 }
 0x24f   : > { %v1373_v54 = vpop.f32.mrb[9].mxu1 }
 0x250   : > { %1337 = vst [vmem:[%s2035_s9 + $0x8] sm:$0xff] %v1305_v52   ;;  %v1374_v55 = vadd.f32 %v1373_v54, %v1372_v53  ;;  %v1375_v56 = vpop.f32.mrb[10].mxu1 }
 0x251   : > { %v1376_v57 = vpop.f32.mrb[11].mxu1 }
 0x252   : > { %v1377_v58 = vadd.f32 %v1376_v57, %v1375_v56  ;;  %v980_v59 = vadd.f32 %v1374_v55, %v2029_v46 }
 0x254   : > { %v981_v60 = vadd.f32 %v1377_v58, %v2029_v46 }
 0x256   : > { %v1310_v61 = vpack.c.bf16 %v981_v60, %v980_v59  ;;  %v1378_v62 = vpop.f32.mrb[12].mxu1 }
 0x257   : > { %v1379_v63 = vpop.f32.mrb[13].mxu1 }
 0x258   : > { %1338 = vst [vmem:[%s2035_s9 + $0x10] sm:$0xff] %v1310_v61   ;;  %v1380_v0 = vadd.f32 %v1379_v63, %v1378_v62  ;;  %v1381_v1 = vpop.f32.mrb[14].mxu1 }
 0x259   : > { %v1382_v2 = vpop.f32.mrb[15].mxu1 }
 0x25a   : > { %v1383_v3 = vadd.f32 %v1382_v2, %v1381_v1  ;;  %v982_v4 = vadd.f32 %v1380_v0, %v2029_v46 }
 0x25c   : > { %v983_v5 = vadd.f32 %v1383_v3, %v2029_v46 }
 0x25e   : > { %v1315_v6 = vpack.c.bf16 %v983_v5, %v982_v4  ;;  %v1384_v7 = vpop.f32.mrb[16].mxu1 }
 0x25f   : > { %v1385_v8 = vpop.f32.mrb[17].mxu1 }
 0x260   : > { %1339 = vst [vmem:[%s2035_s9 + $0x18] sm:$0xff] %v1315_v6   ;;  %v1386_v9 = vadd.f32 %v1385_v8, %v1384_v7  ;;  %v1387_v10 = vpop.f32.mrb[18].mxu1 }
 0x261   : > { %v1388_v11 = vpop.f32.mrb[19].mxu1 }
 0x262   : > { %v1389_v12 = vadd.f32 %v1388_v11, %v1387_v10  ;;  %v984_v13 = vadd.f32 %v1386_v9, %v2029_v46 }
 0x264   : > { %v985_v14 = vadd.f32 %v1389_v12, %v2029_v46 }
 0x266   : > { %v1320_v15 = vpack.c.bf16 %v985_v14, %v984_v13  ;;  %v1390_v16 = vpop.f32.mrb[20].mxu1 }
 0x267   : > { %v1391_v17 = vpop.f32.mrb[21].mxu1 }
 0x268   : > { %1340 = vst [vmem:[%s2035_s9 + $0x20] sm:$0xff] %v1320_v15   ;;  %v1392_v18 = vadd.f32 %v1391_v17, %v1390_v16  ;;  %v1393_v19 = vpop.f32.mrb[22].mxu1 }
 0x269   : > { %v1394_v20 = vpop.f32.mrb[23].mxu1 }
 0x26a   : > { %v1395_v21 = vadd.f32 %v1394_v20, %v1393_v19  ;;  %v986_v22 = vadd.f32 %v1392_v18, %v2029_v46 }
 0x26c   : > { %v987_v23 = vadd.f32 %v1395_v21, %v2029_v46 }
 0x26e   : > { %v1325_v24 = vpack.c.bf16 %v987_v23, %v986_v22  ;;  %v1396_v25 = vpop.f32.mrb[24].mxu1 }
 0x26f   : > { %v1397_v26 = vpop.f32.mrb[25].mxu1 }
 0x270   : > { %1341 = vst [vmem:[%s2035_s9 + $0x28] sm:$0xff] %v1325_v24   ;;  %v1398_v27 = vadd.f32 %v1397_v26, %v1396_v25  ;;  %v1399_v28 = vpop.f32.mrb[26].mxu1 }
 0x271   : > { %v1400_v29 = vpop.f32.mrb[27].mxu1 }
 0x272   : > { %v1401_v30 = vadd.f32 %v1400_v29, %v1399_v28  ;;  %v988_v31 = vadd.f32 %v1398_v27, %v2029_v46 }
 0x274   : > { %v989_v32 = vadd.f32 %v1401_v30, %v2029_v46 }
 0x276   : > { %v1330_v33 = vpack.c.bf16 %v989_v32, %v988_v31  ;;  %v1402_v34 = vpop.f32.mrb[28].mxu1 }
 0x277   : > { %v1403_v35 = vpop.f32.mrb[29].mxu1 }
 0x278   : > { %1342 = vst [vmem:[%s2035_s9 + $0x30] sm:$0xff] %v1330_v33   ;;  %v1404_v36 = vadd.f32 %v1403_v35, %v1402_v34  ;;  %v1405_v37 = vpop.f32.mrb[30].mxu1 }
 0x279   : > { %v1406_v38 = vpop.f32.mrb[31].mxu1 }
 0x27a   : > { %v1407_v47 = vadd.f32 %v1406_v38, %v1405_v37  ;;  %v990_v39 = vadd.f32 %v1404_v36, %v2029_v46 }
 0x27c   : > { %v991_v40 = vadd.f32 %v1407_v47, %v2029_v46 }
 0x27e   : > { %v1335_v41 = vpack.c.bf16 %v991_v40, %v990_v39 }
 0x280   : > { %1343 = vst [vmem:[%s2035_s9 + $0x38] sm:$0xff] %v1335_v41  }
 0x281   : > { %1645 = shalt.err (!%p1642_p11)
}
 0x282   : > { %s1646_s26 = scalar_lea.hbm %s2063_s7, 1024  ;;  %s1650_s6 = scalar_lea.hbm %s2120_s5, 2048 }
 0x283   : > { %p1647_p0 = scmp.ne.s32.totalorder %s2063_s7, %s1646_s26  ;;  %p1651_p6 = scmp.lt.u32.totalorder %s2063_s7, %s2120_s5 }
 0x284   : > { %p1652_p7 = scmp.lt.u32.totalorder %s1650_s6, %s1646_s26  ;;  %p1654_p8 = scmp.lt.u32.totalorder %s1646_s26, %s2063_s7 }
 0x285   : > { %p1648_p4 = pnand %p1647_p0, %p2137_p12 }
 0x286   : > { %p1653_p2 = por %p1652_p7, %p1651_p6 }
 0x287   : > { %p1649_p13 = pneg %p1648_p4 }
 0x288   : > { %p1655_p1 = por %p1654_p8, %p1653_p2 }
 0x28a   : > { %p1656_p10 = pnand %p1655_p1, %p1649_p13 }
 0x28c   : > { %1659 = shalt.err (!%p1656_p10)
}
 0x28d   : > { %s1729_s10 = smov 64   ;;  %s1730_s16 = smov 4  }
 0x28e   : > { %1418 = dma.vmem_to_hbm [thread:$0]  (%p2137_p12), %s2065_s13, 1024, %s2063_s7, %s1073_s14, %s1729_s10, %s1729_s10, %s1730_s16  }
 0x28f PF: > { %s1101_s27 = sand.u32 1, %s1698_s18   ;;  %p2138_p3 = scmp.ne.s32.totalorder %s2129_s29, 0 }
 0x290   : > { %p2139_p5 = scmp.ge.s32.totalorder %s1718_s23, 2  ;;  %s1102_s21 = scalar_lea.sflag [#allocation5], %s1101_s27 }
 0x292   : > { %p1432_p9 = pnand %p2139_p5, %p2138_p3 }
 0x294   : > { %1693 = dma.done.wait (!%p1432_p9), %s1102_s21, 1024  }
 0x295   : > { %1695 = vsyncadd (!%p1432_p9), %s1102_s21, 4294966272  ;;  %s22_s23 = sadd.s32 1, %s1718_s23   ;;  %s2140_s18 = smov %s1702_s19 }
 0x296   : > { %p19_p11 = scmp.ge.s32.totalorder %s22_s23, 4   ;;  %s2141_s19 = smov %s1706_s20 }
 0x297   : > { %s2142_s20 = smov %s1906_s17  ;;  %s2143_s21 = smov %s1714_s22 }
 0x298   : > { %s2144_s22 = smov %s2146_s12  ;;  %21 = sbr.rel (!%p19_p11) target bundleno = 7 (0x7), region = 106 }
 0x29f   :  { %1107 = vsyncpa [#allocation4], 1 }
 0x2a0   :  { %1109 = vsyncpa [#allocation4 + $0x1], 1 }
 0x2a1   :  { %1110 = vsyncpa [#allocation7], 1 }
 0x2a2   :  { %1111 = vsyncpa [#allocation5], 1 }
 0x2a3   :  { %1113 = vsyncpa [#allocation5 + $0x1], 1 }

</bundles_post_ra>
